<compile_context>
chip_gen: v7x
topology: tpu7x:2x2x1
jax: 0.10.0
libtpu: 0.0.40
codegen_flags: <defaults>
</compile_context>

<pallas_src>
import jax
import jax.numpy as jnp
from jax import lax
from jax.experimental import pallas as pl
from jax.experimental.pallas import tpu as pltpu  # noqa: F401  (TPU backend import)


def _model_kernel(x_ref, wenc_t_ref, benc_ref, wfc_ref, bfc_ref, out_ref):
    # x_ref:      (N, C_in, HW)  whole batch, channels on sublanes, pixels on lanes
    # wenc_t_ref: (C_feat, C_in) synthetic encoder (1x1 conv) weight, pre-transposed
    # benc_ref:   (C_feat, 1)    encoder bias (broadcast along the lane/pixel axis)
    # wfc_ref:    (C_feat, K)    fc weight (in x out)
    # bfc_ref:    (1, K)         fc bias
    # out_ref:    (N, K)         softmax probabilities (single store)
    n, _, hw = x_ref.shape
    inv_hw = 1.0 / float(hw)                      # compile-time constant (no divide)

    w_enc_t = wenc_t_ref[...]                     # (C_feat, C_in)
    b_enc = benc_ref[...]                         # (C_feat, 1)

    # --- synthetic encoder (1x1 conv + ReLU) + adaptive_avg_pool2d((1,1)) ---
    # feat is (C_feat, HW): HW sits on the lane axis -> fully packed vregs; the
    # pool is a lane-axis reduce.  N is tiny/static -> trace-time unroll.
    pooled_cols = []
    for b in range(n):
        feat = jnp.dot(w_enc_t, x_ref[b], preferred_element_type=jnp.float32)
        feat = jnp.maximum(feat + b_enc, 0.0)                      # (C_feat, HW)
        pooled_cols.append(jnp.sum(feat, axis=1, keepdims=True))   # (C_feat, 1) unnormalized
    pooled = jnp.concatenate(pooled_cols, axis=1)                  # (C_feat, N)

    # --- dropout: eval-mode identity ---

    # --- fc: one batched Linear(C_feat -> K) for the whole batch.
    # Transposed-lhs contraction -> (N, K); MXU takes the transpose natively,
    # so no XLU transpose instruction is emitted.
    logits = lax.dot_general(
        pooled, wfc_ref[...],
        dimension_numbers=(((0,), (0,)), ((), ())),
        preferred_element_type=jnp.float32,
    )                                                              # (N, K)
    logits = logits * inv_hw + bfc_ref[...]                        # fold mean's 1/HW here

    # --- softmax(dim=1): reduce over the class (lane) axis ---
    m = jnp.max(logits, axis=-1, keepdims=True)
    e = jnp.exp(logits - m)
    denom = jnp.sum(e, axis=-1, keepdims=True)
    r = pl.reciprocal(denom, approx=True)                          # EUP slot
    r = r * (2.0 - denom * r)                                      # Newton step -> ~f32 exact
    out_ref[...] = (e * r).astype(out_ref.dtype)                   # single (N, K) store


def custom_model_forward(x_nchw, w_enc, b_enc, w_fc, b_fc):
    """x_nchw: (N, C_in, H, W) float32.  Returns (N, K) softmax probabilities."""
    N, C_in, H, W = x_nchw.shape
    HW = H * W
    C_feat = w_enc.shape[1]
    K = w_fc.shape[1]

    # Free reshape of NCHW -> (N, C_in, H*W): no data movement, no transpose.
    x = x_nchw.reshape(N, C_in, HW)

    w_enc_t = jnp.transpose(w_enc)            # (C_feat, C_in)
    b_enc_c = b_enc.reshape(C_feat, 1)
    b_fc_r = b_fc.reshape(1, K)

    # Single invocation, no grid: every operand (~8 KB total) lives wholly in VMEM.
    out = pl.pallas_call(
        _model_kernel,
        out_shape=jax.ShapeDtypeStruct((N, K), jnp.float32),
    )(x, w_enc_t, b_enc_c, w_fc, b_fc_r)

    return out


def _reference_forward(x_nchw, w_enc, b_enc, w_fc, b_fc):
    """Pure-JAX reference with identical semantics (for verification)."""
    x = jnp.transpose(x_nchw, (0, 2, 3, 1))                         # NHWC
    feat = jnp.maximum(jnp.einsum('nhwc,cf->nhwf', x, w_enc) + b_enc, 0.0)
    pooled = jnp.mean(feat, axis=(1, 2))                            # (N, C_feat)
    logits = pooled @ w_fc + b_fc                                   # (N, K)
    return jax.nn.softmax(logits, axis=1)


if __name__ == "__main__":
    # Small shapes consistent with the module's forward:
    #   batch=2, in-channels=4, spatial=16x16, encoder out_channels[-1]=32,
    #   num_classes = len(class_names) = 8
    N, C_in, H, W = 2, 4, 16, 16
    C_feat, K = 32, 8

    key = jax.random.PRNGKey(0)
    kx, k1, k2, k3, k4 = jax.random.split(key, 5)

    x = jax.random.normal(kx, (N, C_in, H, W), dtype=jnp.float32)

    # Deterministic synthetic parameters.
    w_enc = 0.1 * jax.random.normal(k1, (C_in, C_feat), dtype=jnp.float32)
    b_enc = 0.01 * jax.random.normal(k2, (C_feat,), dtype=jnp.float32)
    # torch.nn.Linear(C_feat, K): weight (K, C_feat) -> stored here pre-transposed.
    w_fc = 0.1 * jax.random.normal(k3, (C_feat, K), dtype=jnp.float32)
    b_fc = 0.01 * jax.random.normal(k4, (K,), dtype=jnp.float32)

    out = custom_model_forward(x, w_enc, b_enc, w_fc, b_fc)
    out = jax.block_until_ready(out)

    ref = _reference_forward(x, w_enc, b_enc, w_fc, b_fc)
    assert out.shape == (N, K)
    assert jnp.allclose(jnp.sum(out, axis=1), 1.0, atol=1e-5)
    assert jnp.allclose(out, ref, atol=1e-5, rtol=1e-5)

    print("KERNEL_OK")
</pallas_src>

<mosaic_0001>
module attributes {stable_mosaic.version = 11 : i64} {
  func.func @_model_kernel(%arg0: memref<2x4x256xf32, #tpu.memory_space<vmem>>, %arg1: memref<32x4xf32, #tpu.memory_space<vmem>>, %arg2: memref<32x1xf32, #tpu.memory_space<vmem>>, %arg3: memref<32x8xf32, #tpu.memory_space<vmem>>, %arg4: memref<1x8xf32, #tpu.memory_space<vmem>>, %arg5: memref<2x8xf32, #tpu.memory_space<vmem>>) attributes {dimension_semantics = [], scalar_prefetch = 0 : i64, scratch_operands = 0 : i64, tpu.core_type = #tpu.core_type<tc>} {
    %c0 = arith.constant 0 : index
    %c0_0 = arith.constant 0 : index
    %0 = vector.load %arg1[%c0, %c0_0] : memref<32x4xf32, #tpu.memory_space<vmem>>, vector<32x4xf32>
    %c0_1 = arith.constant 0 : index
    %c0_2 = arith.constant 0 : index
    %1 = vector.load %arg2[%c0_1, %c0_2] : memref<32x1xf32, #tpu.memory_space<vmem>>, vector<32x1xf32>
    %c0_3 = arith.constant 0 : index
    %c0_4 = arith.constant 0 : index
    %c0_5 = arith.constant 0 : index
    %2 = vector.load %arg0[%c0_3, %c0_4, %c0_5] : memref<2x4x256xf32, #tpu.memory_space<vmem>>, vector<1x4x256xf32>
    %3 = vector.shape_cast %2 : vector<1x4x256xf32> to vector<4x256xf32>
    %cst = arith.constant dense<0.000000e+00> : vector<32x256xf32>
    %4 = tpu.matmul %0, %3, %cst {dimension_numbers = #tpu.dot_dimension_numbers<[1], [0], [0], [1], [0, 0, 1, 1], [], []>} : vector<32x4xf32>, vector<4x256xf32>, vector<32x256xf32> -> vector<32x256xf32>
    %5 = vector.broadcast %1 : vector<32x1xf32> to vector<32x256xf32>
    %6 = arith.addf %4, %5 : vector<32x256xf32>
    %cst_6 = arith.constant 0.000000e+00 : f32
    %7 = vector.broadcast %cst_6 : f32 to vector<32x256xf32>
    %8 = arith.maximumf %6, %7 : vector<32x256xf32>
    %cst_7 = arith.constant dense<0.000000e+00> : vector<32xf32>
    %9 = vector.multi_reduction <add>, %8, %cst_7 [1] : vector<32x256xf32> to vector<32xf32>
    %10 = vector.shape_cast %9 : vector<32xf32> to vector<32x1xf32>
    %c1 = arith.constant 1 : index
    %c0_8 = arith.constant 0 : index
    %c0_9 = arith.constant 0 : index
    %11 = vector.load %arg0[%c1, %c0_8, %c0_9] : memref<2x4x256xf32, #tpu.memory_space<vmem>>, vector<1x4x256xf32>
    %12 = vector.shape_cast %11 : vector<1x4x256xf32> to vector<4x256xf32>
    %cst_10 = arith.constant dense<0.000000e+00> : vector<32x256xf32>
    %13 = tpu.matmul %0, %12, %cst_10 {dimension_numbers = #tpu.dot_dimension_numbers<[1], [0], [0], [1], [0, 0, 1, 1], [], []>} : vector<32x4xf32>, vector<4x256xf32>, vector<32x256xf32> -> vector<32x256xf32>
    %14 = vector.broadcast %1 : vector<32x1xf32> to vector<32x256xf32>
    %15 = arith.addf %13, %14 : vector<32x256xf32>
    %cst_11 = arith.constant 0.000000e+00 : f32
    %16 = vector.broadcast %cst_11 : f32 to vector<32x256xf32>
    %17 = arith.maximumf %15, %16 : vector<32x256xf32>
    %cst_12 = arith.constant dense<0.000000e+00> : vector<32xf32>
    %18 = vector.multi_reduction <add>, %17, %cst_12 [1] : vector<32x256xf32> to vector<32xf32>
    %19 = vector.shape_cast %18 : vector<32xf32> to vector<32x1xf32>
    %20 = tpu.concatenate %10, %19 in 1 : vector<32x1xf32>, vector<32x1xf32> -> vector<32x2xf32>
    %c0_13 = arith.constant 0 : index
    %c0_14 = arith.constant 0 : index
    %21 = vector.load %arg3[%c0_13, %c0_14] : memref<32x8xf32, #tpu.memory_space<vmem>>, vector<32x8xf32>
    %cst_15 = arith.constant dense<0.000000e+00> : vector<2x8xf32>
    %22 = tpu.matmul %20, %21, %cst_15 {dimension_numbers = #tpu.dot_dimension_numbers<[0], [0], [1], [1], [0, 1, 1, 1], [], []>} : vector<32x2xf32>, vector<32x8xf32>, vector<2x8xf32> -> vector<2x8xf32>
    %cst_16 = arith.constant 3.906250e-03 : f32
    %23 = vector.broadcast %cst_16 : f32 to vector<2x8xf32>
    %24 = arith.mulf %22, %23 : vector<2x8xf32>
    %c0_17 = arith.constant 0 : index
    %c0_18 = arith.constant 0 : index
    %25 = vector.load %arg4[%c0_17, %c0_18] : memref<1x8xf32, #tpu.memory_space<vmem>>, vector<1x8xf32>
    %26 = vector.broadcast %25 : vector<1x8xf32> to vector<2x8xf32>
    %27 = arith.addf %24, %26 : vector<2x8xf32>
    %cst_19 = arith.constant dense<0xFF800000> : vector<2xf32>
    %28 = vector.multi_reduction <maximumf>, %27, %cst_19 [1] : vector<2x8xf32> to vector<2xf32>
    %29 = vector.shape_cast %28 : vector<2xf32> to vector<2x1xf32>
    %30 = vector.broadcast %29 : vector<2x1xf32> to vector<2x8xf32>
    %31 = arith.subf %27, %30 : vector<2x8xf32>
    %32 = math.exp %31 : vector<2x8xf32>
    %cst_20 = arith.constant dense<0.000000e+00> : vector<2xf32>
    %33 = vector.multi_reduction <add>, %32, %cst_20 [1] : vector<2x8xf32> to vector<2xf32>
    %34 = vector.shape_cast %33 : vector<2xf32> to vector<2x1xf32>
    %35 = tpu.reciprocal %34 {approx = true} : vector<2x1xf32> -> vector<2x1xf32>
    %36 = arith.mulf %34, %35 : vector<2x1xf32>
    %cst_21 = arith.constant 2.000000e+00 : f32
    %37 = vector.broadcast %cst_21 : f32 to vector<2x1xf32>
    %38 = arith.subf %37, %36 : vector<2x1xf32>
    %39 = arith.mulf %35, %38 : vector<2x1xf32>
    %40 = vector.broadcast %39 : vector<2x1xf32> to vector<2x8xf32>
    %41 = arith.mulf %32, %40 : vector<2x8xf32>
    %c0_22 = arith.constant 0 : index
    %c0_23 = arith.constant 0 : index
    %42 = vector.load %arg5[%c0_22, %c0_23] : memref<2x8xf32, #tpu.memory_space<vmem>>, vector<2x8xf32>
    tpu.vector_store %arg5[%c0_22, %c0_23], %41 {strides = array<i32>} : memref<2x8xf32, #tpu.memory_space<vmem>>, vector<2x8xf32>,
    return
  }
}

</mosaic_0001>

<bundles_post_ra>
// kernel: tpu_custom_call.1
= control target key start
LH: loop header
LB: loop body
LE: loop exit
PB: predicated region body
PF: predicated region fallthrough
CT: control target
= control target key end

     0   :  { %vm65_vm0 = vcmask 1043456   ;;  %v524_v4 = vmov 0.0   ;;  %vm52_vm1 = vcmask 31744   ;;  %v525_v6 = vmov 0   ;;  %s640_s0 = inlined_call_operand.vmem [shape: f32[2,4,256], index: 0, kind: input, shape index: {}]   ;;  %s641_s1 = inlined_call_operand.vmem [shape: f32[32,4], index: 1, kind: input, shape index: {}]   ;;  %s642_s2 = inlined_call_operand.vmem [shape: f32[32,1], index: 2, kind: input, shape index: {}]   ;;  %s643_s3 = inlined_call_operand.vmem [shape: f32[32,8], index: 3, kind: input, shape index: {}]   ;;  %s644_s4 = inlined_call_operand.vmem [shape: f32[1,8], index: 4, kind: input, shape index: {}]   ;;  %s645_s5 = inlined_call_operand.hbm [shape: f32[2,8], index: 5, kind: output, shape index: {}]  }
   0x1   :  { %v29_v0 = vld [vmem:[%s640_s0] sm:$0xff]  ;;  %v456_v1 = vld [vmem:[%s640_s0 + $0x8] sm:$0xff]  ;;  %134 = vmatprep.mubr.f32.mxu0 %v524_v4  ;;  %251 = vmatprep.mubr.f32.mxu1 %v524_v4 }
   0x2   :  { %v51_v2 = vcombine.high %v29_v0, %v29_v0  ;;  %v182_v3 = vcombine.high %v456_v1, %v456_v1  ;;  %v21_v5 = vld [vmem:[%s641_s1] sm:$0xff]  ;;  %492 = vset.pattern.permute.xlu0 %v525_v6  ;;  %493 = vset.pattern.permute.xlu1 %v525_v6 }
   0x4   :  { %450 = vmatprep.subr.msk.mxu0 %vm65_vm0, %v51_v2  ;;  %457 = vmatprep.subr.msk.mxu1 %vm65_vm0, %v182_v3 }
   0x5   :  { %10 = vsyncpa [#allocation3], 0  ;;  %451 = vmatpush1.msk.msra.mxu0 %vm65_vm0, %v29_v0  ;;  %458 = vmatpush1.msk.msra.mxu1 %vm65_vm0, %v456_v1  ;;  %v25_v7 = vld [vmem:[%s642_s2] sm:$0xff]  ;;  %v27_v8 = vld [vmem:[%s642_s2 + $0x10] sm:$0xff]  ;;  %vm527_vm2 = vmmov 0   ;;  %vm296_vm3 = vcmask 7168  }
   0x6   :  { %452 = vmatmul.mubr.msk.f32.vlgmr.msra.gmra.mrb[0].mxu0 %vm52_vm1, %v21_v5  ;;  %459 = vmatmul.mubr.msk.f32.vlgmr.msra.gmra.mrb[0].mxu1 %vm52_vm1, %v21_v5  ;;  %v22_v9 = vld [vmem:[%s641_s1 + $0x8] sm:$0xff]  ;;  %v28_v11 = vld [vmem:[%s642_s2 + $0x18] sm:$0xff]  ;;  %v23_v12 = vld [vmem:[%s641_s1 + $0x10] sm:$0xff]  ;;  %vm337_vm4 = vcmask 261120   ;;  %vm420_vm5 = vcmask 58368  }
   0x7   :  { %140 = vmatprep.mubr.f32.mxu0 %v524_v4  ;;  %257 = vmatprep.mubr.f32.mxu1 %v524_v4  ;;  %v26_v10 = vld [vmem:[%s642_s2 + $0x8] sm:$0xff]  ;;  %v24_v13 = vld [vmem:[%s641_s1 + $0x18] sm:$0xff] }
   0x8   :  { %32 = vperm.xlu0 %492, %v25_v7   ;;  %42 = vperm.xlu1 %493, %v27_v8  }
   0xa   :  { %453 = vmatmul.mubr.msk.f32.gmra.mrb[2].mxu0 %vm52_vm1, %v22_v9  ;;  %460 = vmatmul.mubr.msk.f32.gmra.mrb[2].mxu1 %vm52_vm1, %v22_v9 }
   0xb   :  { %146 = vmatprep.mubr.f32.mxu0 %v524_v4  ;;  %263 = vmatprep.mubr.f32.mxu1 %v524_v4 }
   0xc   :  { %37 = vperm.xlu0 %492, %v26_v10   ;;  %47 = vperm.xlu1 %493, %v28_v11   ;;  %v301_v11 = vld [vmem:[%s643_s3] sm:$0xff] }
   0xe   :  { %454 = vmatmul.mubr.msk.f32.gmra.mrb[4].mxu0 %vm52_vm1, %v23_v12  ;;  %461 = vmatmul.mubr.msk.f32.gmra.mrb[4].mxu1 %vm52_vm1, %v23_v12  ;;  %v302_v12 = vld [vmem:[%s643_s3 + $0x8] sm:$0xff] }
   0xf   :  { %152 = vmatprep.mubr.f32.mxu0 %v524_v4  ;;  %269 = vmatprep.mubr.f32.mxu1 %v524_v4 }
  0x12   :  { %455 = vmatmul.mubr.msk.f32.gmra.mrb[6].mxu0 %vm52_vm1, %v24_v13  ;;  %462 = vmatmul.mubr.msk.f32.gmra.mrb[6].mxu1 %vm52_vm1, %v24_v13  ;;  %v303_v13 = vld [vmem:[%s643_s3 + $0x10] sm:$0xff] }
  0x13   :  { %478 = vmatprep.mubr.msk.f32.mxu0 %vm527_vm2, %v524_v4 }
  0x87   :  { %v33_v14 = vpop.permute.xlu0 %32  ;;  %v43_v26 = vpop.permute.xlu1 %42 }
  0x8b   :  { %v38_v25 = vpop.permute.xlu0 %37  ;;  %v48_v52 = vpop.permute.xlu1 %47 }
  0xd9   :  { %v136_v15 = vpop.f32.mrb[0].mxu0  ;;  %v253_v16 = vpop.f32.mrb[0].mxu1 }
  0xda   :  { %v137_v17 = vadd.f32 %v136_v15, %v33_v14  ;;  %v254_v18 = vadd.f32 %v253_v16, %v33_v14  ;;  %v138_v19 = vpop.f32.mrb[1].mxu0  ;;  %v255_v20 = vpop.f32.mrb[1].mxu1  ;;  %v482_v15 = vpack.c.bf16 %v302_v12, %v301_v11  ;;  %v304_v16 = vld [vmem:[%s643_s3 + $0x18] sm:$0xff] }
  0xdb   :  { %v139_v21 = vadd.f32 %v138_v19, %v33_v14  ;;  %v256_v22 = vadd.f32 %v255_v20, %v33_v14  ;;  %v526_v14 = vmov 0.0|0.0  }
  0xdc   :  { %v159_v23 = vmax.f32 %v137_v17, 0.0  ;;  %v276_v24 = vmax.f32 %v254_v18, 0.0  ;;  %481 = vmatprep.subr.bf16.mxu0 %v526_v14  ;;  %v485_v17 = vpack.c.bf16 %v304_v16, %v303_v13 }
  0xdd   :  { %v160_v27 = vmax.f32 %v139_v21, 0.0  ;;  %v277_v28 = vmax.f32 %v256_v22, 0.0  ;;  %v142_v29 = vpop.f32.mrb[2].mxu0  ;;  %v259_v30 = vpop.f32.mrb[2].mxu1  ;;  %483 = vmatpush3.bf16.msra.mxu0 %v482_v15 }
  0xde   :  { %v143_v31 = vadd.f32 %v142_v29, %v38_v25  ;;  %v260_v32 = vadd.f32 %v259_v30, %v38_v25  ;;  %v144_v33 = vpop.f32.mrb[3].mxu0  ;;  %v261_v34 = vpop.f32.mrb[3].mxu1  ;;  %484 = vmatprep.subr.bf16.mxu0 %v526_v14 }
  0xdf   :  { %v145_v35 = vadd.f32 %v144_v33, %v38_v25  ;;  %v262_v36 = vadd.f32 %v261_v34, %v38_v25  ;;  %v284_v37 = vadd.f32 %v277_v28, %v276_v24  ;;  %v167_v38 = vadd.f32 %v160_v27, %v159_v23 }
  0xe0   :  { %v161_v39 = vmax.f32 %v143_v31, 0.0  ;;  %v278_v40 = vmax.f32 %v260_v32, 0.0  ;;  %v464_v31 = vld [vmem:[%s644_s4] ss:$0 sm:$0xff]  ;;  %s528_s4 = smov [#allocation2]  }
  0xe1   :  { %v162_v41 = vmax.f32 %v145_v35, 0.0  ;;  %v279_v42 = vmax.f32 %v262_v36, 0.0  ;;  %285 = vadd.xlane.f32.xlu1 %v284_v37  ;;  %v148_v43 = vpop.f32.mrb[4].mxu0  ;;  %168 = vadd.xlane.f32.xlu0 %v167_v38  ;;  %v265_v44 = vpop.f32.mrb[4].mxu1  ;;  %s442_s19 = sshll.u32 %s528_s4, 4  ;;  %s443_s19 = int_to_ptr.vmem [resolvable:$true] %s442_s19 }
  0xe2   :  { %v150_v45 = vpop.f32.mrb[5].mxu0  ;;  %v266_v46 = vadd.f32 %v265_v44, %v43_v26  ;;  %v267_v47 = vpop.f32.mrb[5].mxu1  ;;  %v149_v48 = vadd.f32 %v148_v43, %v43_v26  ;;  %486 = vmatpush3.bf16.msra.mxu0 %v485_v17  ;;  %s500_s20 = scalar_lea.vmem %s443_s19, 32  ;;  %p505_p1 = scmp.lt.s32.totalorder %s443_s19, %s443_s19 }
  0xe3   :  { %v151_v49 = vadd.f32 %v150_v45, %v43_v26  ;;  %v268_v50 = vadd.f32 %v267_v47, %v43_v26  ;;  %v170_v51 = vadd.f32 %v162_v41, %v161_v39  ;;  %v287_v53 = vadd.f32 %v279_v42, %v278_v40  ;;  %p501_p0 = scmp.ne.s32.totalorder %s443_s19, %s500_s20  ;;  %p506_p2 = scmp.lt.s32.totalorder %s500_s20, %s500_s20 }
  0xe4   :  { %v280_v54 = vmax.f32 %v266_v46, 0.0  ;;  %v163_v55 = vmax.f32 %v149_v48, 0.0 }
  0xe5   :  { %v164_v56 = vmax.f32 %v151_v49, 0.0  ;;  %v281_v57 = vmax.f32 %v268_v50, 0.0  ;;  %v154_v58 = vpop.f32.mrb[6].mxu0  ;;  %v271_v59 = vpop.f32.mrb[6].mxu1  ;;  %171 = vadd.xlane.f32.xlu0 %v170_v51  ;;  %p507_p3 = por %p506_p2, %p505_p1 }
  0xe6   :  { %v156_v60 = vpop.f32.mrb[7].mxu0  ;;  %v273_v61 = vpop.f32.mrb[7].mxu1  ;;  %v155_v62 = vadd.f32 %v154_v58, %v48_v52  ;;  %v272_v63 = vadd.f32 %v271_v59, %v48_v52 }
  0xe7   :  { %v157_v0 = vadd.f32 %v156_v60, %v48_v52  ;;  %v274_v1 = vadd.f32 %v273_v61, %v48_v52  ;;  %v173_v2 = vadd.f32 %v164_v56, %v163_v55  ;;  %v290_v3 = vadd.f32 %v281_v57, %v280_v54  ;;  %p508_p4 = pnand %p507_p3, %p501_p0 }
  0xe8   :  { %v165_v5 = vmax.f32 %v155_v62, 0.0  ;;  %v282_v6 = vmax.f32 %v272_v63, 0.0 }
  0xe9   :  { %v166_v7 = vmax.f32 %v157_v0, 0.0  ;;  %v283_v8 = vmax.f32 %v274_v1, 0.0  ;;  %174 = vadd.xlane.f32.xlu1 %v173_v2  ;;  %288 = vadd.xlane.f32.xlu0 %v287_v53 }
  0xeb   :  { %v176_v9 = vadd.f32 %v166_v7, %v165_v5  ;;  %v293_v10 = vadd.f32 %v283_v8, %v282_v6 }
  0xed   :  { %177 = vadd.xlane.f32.xlu1 %v176_v9  ;;  %291 = vadd.xlane.f32.xlu0 %v290_v3 }
  0xf1   :  { %294 = vadd.xlane.f32.xlu0 %v293_v10 }
 0x16e   :  { %v286_v18 = vpop.xlane.xlu1 %285  ;;  %v169_v19 = vpop.xlane.xlu0 %168 }
 0x16f   :  { %v297_v20 = vsel %vm296_vm3, %v169_v19, %v286_v18 }
 0x170   :  { %305 = vxpose.xlu1.b32.start [1/4] (short) (narrow) %v297_v20, 8 }
 0x172   :  { %v172_v21 = vpop.xlane.xlu0 %171 }
 0x176   :  { %v289_v22 = vpop.xlane.xlu0 %288  ;;  %v175_v24 = vpop.xlane.xlu1 %174 }
 0x177   :  { %v298_v23 = vsel %vm296_vm3, %v172_v21, %v289_v22 }
 0x178   :  { %306 = vxpose.xlu1.b32.cont [2/4] (short) (narrow) %v298_v23, 8 }
 0x17a   :  { %v292_v25 = vpop.xlane.xlu0 %291  ;;  %v178_v27 = vpop.xlane.xlu1 %177 }
 0x17b   :  { %v299_v26 = vsel %vm296_vm3, %v175_v24, %v292_v25 }
 0x17c   :  { %307 = vxpose.xlu1.b32.cont [3/4] (short) (narrow) %v299_v26, 8 }
 0x17e   :  { %v295_v28 = vpop.xlane.xlu0 %294 }
 0x17f   :  { %v300_v4 = vsel %vm296_vm3, %v178_v27, %v295_v28 }
 0x180   :  { %308 = vxpose.xlu1.b32.end [4/4] (short) (narrow) %v300_v4, 8 }
 0x1f4   :  { %v321_v29 = vpop.trf.xlu1 }
 0x1f5   :  { %479 = vmatmul.mubr.msk.f32.vlgmr.msra.gmra.mrb[8].mxu0 %vm337_vm4, %v321_v29 }
 0x2c8   :  { %v407_v30 = vpop.f32.mrb[8].mxu0 }
 0x2c9   :  { %v411_v32 = vmul.f32 0.00390625, %v407_v30  ;;  %v480_v33 = vpop.f32.mrb[9].mxu0 }
 0x2cb   :  { %v419_v34 = vadd.f32 %v464_v31, %v411_v32 }
 0x2cd   :  { %v421_v35 = vsel %vm420_vm5, %v419_v34, -inf }
 0x2ce   :  { %422 = vmax.xlane.f32.xlu0 %v421_v35 }
 0x35b   :  { %v423_v36 = vpop.xlane.xlu0 %422 }
 0x35c   :  { %v424_v37 = vsub.f32 %v419_v34, %v423_v36 }
 0x35e   :  { %v425_v38 = vmul.f32 1.442695, %v424_v37 }
 0x360   :  { %496 = vpow2.f32 %v425_v38 }
 0x36a   :  { %v497_v39 = vpop.eup %496 }
 0x36b   :  { %v427_v40 = vsel %vm420_vm5, %v497_v39, 0.0 }
 0x36c   :  { %428 = vadd.xlane.f32.xlu0 %v427_v40 }
 0x3f9   :  { %v429_v41 = vpop.xlane.xlu0 %428 }
 0x3fa   :  { %498 = vrcp.f32 %v429_v41 }
 0x404   :  { %v499_v42 = vpop.eup %498 }
 0x405   :  { %v431_v43 = vmul.f32 %v499_v42, %v429_v41 }
 0x407   :  { %v432_v44 = vsub.f32 2.0, %v431_v43 }
 0x409   :  { %v433_v45 = vmul.f32 %v499_v42, %v432_v44 }
 0x40b   :  { %v434_v46 = vmul.f32 %v497_v39, %v433_v45 }
 0x40d   :  { %435 = vst.msk [vmem:[#allocation2] sm:$0x3] %vm420_vm5, %v434_v46 }
 0x40e   :  { %511 = shalt.err (!%p508_p4)
}
 0x40f   :  { %s512_s23 = scalar_lea.hbm %s645_s5, 32 }
 0x410   :  { %p513_p5 = scmp.ne.s32.totalorder %s645_s5, %s512_s23  ;;  %p516_p6 = scmp.lt.u32.totalorder %s512_s23, %s645_s5 }
 0x412   :  { %p518_p7 = pnand %p516_p6, %p513_p5 }
 0x414   :  { %521 = shalt.err (!%p518_p7)
}
 0x415   :  { %445 = dma.vmem_to_hbm [thread:$0]  %s443_s19, 32, %s645_s5, [#allocation3]  }
 0x416   :  { %522 = dma.done.wait [#allocation3], 32  }
 0x417   :  { %523 = vsyncadd [#allocation3], 4294967264 }
 0x418   :  { %449 = vsyncpa [#allocation3], 1 }

</bundles_post_ra>
